<compile_context>
chip_gen: v5e
topology: v5e:2x2
jax: 0.10.0
libtpu: 0.0.40
codegen_flags: <defaults>
</compile_context>

<pallas_src>
import functools

import jax
import jax.numpy as jnp
from jax import lax
from jax.experimental import pallas as pl
from jax.experimental.pallas import tpu as pltpu


def _channel_attention_kernel(x_ref, w1_ref, w2_ref, o_ref, sum_acc, max_acc,
                              *, hw_total, tile_t, needs_mask):
    """Grid = (B, n_spatial). x_ref is one (1, C, T) spatial tile of one image."""
    s = pl.program_id(1)
    last = pl.num_programs(1) - 1

    @pl.when(s == 0)
    def _init():
        sum_acc[...] = jnp.zeros(sum_acc.shape, dtype=sum_acc.dtype)
        max_acc[...] = jnp.full(max_acc.shape, -jnp.inf, dtype=max_acc.dtype)

    x = x_ref[...]                                    # (1, C, T), native dtype

    def _accumulate(xs, xm):
        # Sum accumulates in f32; max stays in the native dtype (exact), so the
        # max path needs no conversion work at all.
        sum_acc[...] += jnp.sum(xs, axis=-1, keepdims=True, dtype=jnp.float32)
        max_acc[...] = jnp.maximum(max_acc[...],
                                   jnp.max(xm, axis=-1, keepdims=True))

    if needs_mask:
        # Only the final spatial tile contains out-of-bounds (padded) lanes, so
        # only that single grid step pays for the iota/select masking.
        @pl.when(s < last)
        def _bulk():
            _accumulate(x, x)

        @pl.when(s == last)
        def _tail():
            lane = lax.broadcasted_iota(jnp.int32, x.shape, 2)
            valid = lane < (hw_total - s * tile_t)
            _accumulate(jnp.where(valid, x, 0),          # 0    = sum identity
                        jnp.where(valid, x, -jnp.inf))   # -inf = max identity
    else:
        _accumulate(x, x)

    # One-shot epilogue: shared MLP + sigmoid, executed once per image.
    @pl.when(s == last)
    def _epilogue():
        avg = sum_acc[...][0] * (1.0 / float(hw_total))      # (C, 1) f32
        mx = max_acc[...][0].astype(jnp.float32)             # (C, 1) f32
        p = jnp.concatenate([avg, mx], axis=1)               # (C, 2): [avg | max]
        w1 = w1_ref[...]                                      # (mid, C) f32
        w2 = w2_ref[...]                                      # (C, mid) f32
        h = jnp.maximum(
            jnp.dot(w1, p, preferred_element_type=jnp.float32), 0.0)   # (mid, 2)
        y = jnp.dot(w2, h, preferred_element_type=jnp.float32)         # (C, 2)
        out = jax.nn.sigmoid(y[:, 0:1] + y[:, 1:2])           # (C, 1)
        o_ref[...] = out.reshape(o_ref.shape).astype(o_ref.dtype)


def _plan_tiles(hw, c, itemsize):
    """Pick spatial tile lanes T and the scoped-VMEM limit to request."""
    try:
        cap = int(pltpu.get_tpu_info().vmem_capacity_bytes)
    except Exception:
        cap = 64 << 20                      # conservative (v7x-sized) fallback
    # Scoped VMEM we are willing to request - well inside physical capacity.
    scoped = min(cap // 2, 48 << 20)
    # Extra native-tile-sized temporaries the compiler may materialize:
    #   * sub-32-bit inputs: f32 upcast of the tile feeding the sum reduce.
    #   * masked tail step: iota mask + two select outputs.
    conv = 0.0 if itemsize >= 4 else 2.0

    def max_lanes(factor):
        per_block = int(scoped / factor)
        return max(128, per_block // (c * itemsize) // 128 * 128)

    t = max_lanes(2.5 + conv)               # 2 double-buffered x blocks + slack
    if t >= hw:
        return hw, scoped                   # one full-extent block, no masking
    if hw % t != 0:
        t = max_lanes(6.5 + 1.5 * conv)     # headroom for tail-mask temporaries
    return t, scoped


def channel_attention(x_nchw, w_fc1, w_fc2, *, tile_lanes=None):
    """x_nchw: (B, C, H, W); w_fc1: (mid, C, 1, 1); w_fc2: (C, mid, 1, 1).

    Returns the (B, C, 1, 1) attention map matching the PyTorch module output.
    """
    B, C, H, W = x_nchw.shape
    mid = w_fc1.shape[0]
    hw = H * W

    # Free reshape: NCHW is already contiguous as (B, C, H*W); keep native dtype
    # so HBM traffic is not doubled by a wrapper-side cast.
    x_flat = x_nchw.reshape(B, C, hw)
    itemsize = jnp.dtype(x_flat.dtype).itemsize

    # Conv1x1 weights as 2-D matrices in their native (out, in) orientation.
    w1 = w_fc1.reshape(mid, C).astype(jnp.float32)      # (mid, C)
    w2 = w_fc2.reshape(C, mid).astype(jnp.float32)      # (C, mid)

    T, vmem_limit = _plan_tiles(hw, C, itemsize)
    if tile_lanes is not None:           # test hook: force a tile (mult. of 128)
        T = int(tile_lanes)
    n_spatial = -(-hw // T)
    needs_mask = (hw % T) != 0

    cost = pl.CostEstimate(
        flops=2 * B * C * hw + 8 * B * C * mid,
        transcendentals=B * C,
        bytes_accessed=B * C * hw * itemsize + 2 * C * mid * 4 + B * C * itemsize,
    )

    kernel = functools.partial(
        _channel_attention_kernel,
        hw_total=hw, tile_t=T, needs_mask=needs_mask)

    out = pl.pallas_call(
        kernel,
        out_shape=jax.ShapeDtypeStruct((B, C, 1), x_flat.dtype),
        grid_spec=pltpu.PrefetchScalarGridSpec(
            num_scalar_prefetch=0,
            grid=(B, n_spatial),
            in_specs=[
                pl.BlockSpec((1, C, T), lambda b, s: (b, 0, s)),
                pl.BlockSpec((mid, C), lambda b, s: (0, 0)),
                pl.BlockSpec((C, mid), lambda b, s: (0, 0)),
            ],
            # Output block index is constant across the spatial (reduction)
            # axis: it stays resident in VMEM and is written once (epilogue).
            out_specs=pl.BlockSpec((1, C, 1), lambda b, s: (b, 0, 0)),
            scratch_shapes=[
                pltpu.VMEM((1, C, 1), jnp.float32),     # running sum (f32)
                pltpu.VMEM((1, C, 1), x_flat.dtype),    # running max (native)
            ],
        ),
        compiler_params=pltpu.CompilerParams(
            dimension_semantics=("parallel", "arbitrary"),
            vmem_limit_bytes=int(vmem_limit),
        ),
        cost_estimate=cost,
    )(x_flat, w1, w2)

    return out.reshape(B, C, 1, 1)


def channel_attention_ref(x_nchw, w_fc1, w_fc2):
    """Pure-JAX reference mirroring the PyTorch forward."""
    B, C, H, W = x_nchw.shape
    mid = w_fc1.shape[0]
    avg = jnp.mean(x_nchw.astype(jnp.float32), axis=(2, 3))    # (B, C)
    mx = jnp.max(x_nchw.astype(jnp.float32), axis=(2, 3))      # (B, C)
    w1 = w_fc1.reshape(mid, C).astype(jnp.float32)
    w2 = w_fc2.reshape(C, mid).astype(jnp.float32)

    def fc(p):
        h = jnp.maximum(p @ w1.T, 0.0)
        return h @ w2.T

    out = jax.nn.sigmoid(fc(avg) + fc(mx))
    return out.astype(x_nchw.dtype).reshape(B, C, 1, 1)


if __name__ == "__main__":
    # Shapes consistent with the module: in_planes=32, ratio=16 -> mid=2.
    B, C, H, W = 2, 32, 16, 16
    ratio = 16
    mid = C // ratio

    key = jax.random.PRNGKey(0)
    kx, k1, k2 = jax.random.split(key, 3)
    x = jax.random.normal(kx, (B, C, H, W), dtype=jnp.float32)
    # Conv2d weight shapes: (out, in, 1, 1)
    w_fc1 = jax.random.normal(k1, (mid, C, 1, 1), dtype=jnp.float32) * 0.1
    w_fc2 = jax.random.normal(k2, (C, mid, 1, 1), dtype=jnp.float32) * 0.1

    out = jax.block_until_ready(channel_attention(x, w_fc1, w_fc2))
    ref = channel_attention_ref(x, w_fc1, w_fc2)
    assert out.shape == (B, C, 1, 1)
    assert jnp.allclose(out, ref, atol=1e-5, rtol=1e-5), "mismatch vs reference"

    # Exercise the masked-tail path (H*W = 400, not a multiple of the forced
    # 128-lane tile) so the iota/select tail logic is verified on-device too.
    x2 = jax.random.normal(jax.random.PRNGKey(1), (B, C, 20, 20),
                           dtype=jnp.float32)
    out2 = jax.block_until_ready(
        channel_attention(x2, w_fc1, w_fc2, tile_lanes=128))
    ref2 = channel_attention_ref(x2, w_fc1, w_fc2)
    assert out2.shape == (B, C, 1, 1)
    assert jnp.allclose(out2, ref2, atol=1e-5, rtol=1e-5), "masked-tail mismatch"

    print("KERNEL_OK")
</pallas_src>

<mosaic_0001>
module attributes {stable_mosaic.version = 11 : i64} {
  func.func @_channel_attention_kernel(%arg0: i32, %arg1: i32, %arg2: memref<1x32x256xf32, #tpu.memory_space<vmem>>, %arg3: memref<2x32xf32, #tpu.memory_space<vmem>>, %arg4: memref<32x2xf32, #tpu.memory_space<vmem>>, %arg5: memref<1x32x1xf32, #tpu.memory_space<vmem>>, %arg6: memref<1x32x1xf32, #tpu.memory_space<vmem>>, %arg7: memref<1x32x1xf32, #tpu.memory_space<vmem>>) attributes {dimension_semantics = [#tpu.dimension_semantics<parallel>, #tpu.dimension_semantics<arbitrary>], iteration_bounds = array<i64: 2, 1>, scalar_prefetch = 0 : i64, scratch_operands = 2 : i64, tpu.core_type = #tpu.core_type<tc>, window_params = [{transform_indices = @transform_0, window_bounds = array<i64: 1, 32, 256>}, {pipeline_mode = #tpu.pipeline_mode<synchronous>, transform_indices = @transform_1, window_bounds = array<i64: 2, 32>}, {pipeline_mode = #tpu.pipeline_mode<synchronous>, transform_indices = @transform_2, window_bounds = array<i64: 32, 2>}, {transform_indices = @transform_3, window_bounds = array<i64: 1, 32, 1>}]} {
    %c0_i32 = arith.constant 0 : i32
    %0 = arith.cmpi eq, %arg1, %c0_i32 : i32
    %1 = arith.extui %0 : i1 to i32
    %c0_i32_0 = arith.constant 0 : i32
    %2 = arith.cmpi ne, %1, %c0_i32_0 : i32
    scf.if %2 {
      %cst_18 = arith.constant 0.000000e+00 : f32
      %17 = vector.broadcast %cst_18 : f32 to vector<1x32x1xf32>
      %c0_19 = arith.constant 0 : index
      %c0_20 = arith.constant 0 : index
      %c0_21 = arith.constant 0 : index
      %18 = vector.load %arg6[%c0_19, %c0_20, %c0_21] : memref<1x32x1xf32, #tpu.memory_space<vmem>>, vector<1x32x1xf32>
      tpu.vector_store %arg6[%c0_19, %c0_20, %c0_21], %17 {strides = array<i32>} : memref<1x32x1xf32, #tpu.memory_space<vmem>>, vector<1x32x1xf32>,
      %cst_22 = arith.constant 0xFF800000 : f32
      %19 = vector.broadcast %cst_22 : f32 to vector<1x32x1xf32>
      %c0_23 = arith.constant 0 : index
      %c0_24 = arith.constant 0 : index
      %c0_25 = arith.constant 0 : index
      %20 = vector.load %arg7[%c0_23, %c0_24, %c0_25] : memref<1x32x1xf32, #tpu.memory_space<vmem>>, vector<1x32x1xf32>
      tpu.vector_store %arg7[%c0_23, %c0_24, %c0_25], %19 {strides = array<i32>} : memref<1x32x1xf32, #tpu.memory_space<vmem>>, vector<1x32x1xf32>,
    } else {
    }
    %c0 = arith.constant 0 : index
    %c0_1 = arith.constant 0 : index
    %c0_2 = arith.constant 0 : index
    %3 = vector.load %arg2[%c0, %c0_1, %c0_2] : memref<1x32x256xf32, #tpu.memory_space<vmem>>, vector<1x32x256xf32>
    %c0_3 = arith.constant 0 : index
    %c0_4 = arith.constant 0 : index
    %c0_5 = arith.constant 0 : index
    %4 = vector.load %arg6[%c0_3, %c0_4, %c0_5] : memref<1x32x1xf32, #tpu.memory_space<vmem>>, vector<1x32x1xf32>
    %cst = arith.constant dense<0.000000e+00> : vector<1x32xf32>
    %5 = vector.multi_reduction <add>, %3, %cst [2] : vector<1x32x256xf32> to vector<1x32xf32>
    %6 = vector.shape_cast %5 : vector<1x32xf32> to vector<1x32x1xf32>
    %7 = arith.addf %4, %6 : vector<1x32x1xf32>
    %c0_6 = arith.constant 0 : index
    %c0_7 = arith.constant 0 : index
    %c0_8 = arith.constant 0 : index
    %8 = vector.load %arg6[%c0_6, %c0_7, %c0_8] : memref<1x32x1xf32, #tpu.memory_space<vmem>>, vector<1x32x1xf32>
    tpu.vector_store %arg6[%c0_6, %c0_7, %c0_8], %7 {strides = array<i32>} : memref<1x32x1xf32, #tpu.memory_space<vmem>>, vector<1x32x1xf32>,
    %c0_9 = arith.constant 0 : index
    %c0_10 = arith.constant 0 : index
    %c0_11 = arith.constant 0 : index
    %9 = vector.load %arg7[%c0_9, %c0_10, %c0_11] : memref<1x32x1xf32, #tpu.memory_space<vmem>>, vector<1x32x1xf32>
    %cst_12 = arith.constant dense<0xFF800000> : vector<1x32xf32>
    %10 = vector.multi_reduction <maximumf>, %3, %cst_12 [2] : vector<1x32x256xf32> to vector<1x32xf32>
    %11 = vector.shape_cast %10 : vector<1x32xf32> to vector<1x32x1xf32>
    %12 = arith.maximumf %9, %11 : vector<1x32x1xf32>
    %c0_13 = arith.constant 0 : index
    %c0_14 = arith.constant 0 : index
    %c0_15 = arith.constant 0 : index
    %13 = vector.load %arg7[%c0_13, %c0_14, %c0_15] : memref<1x32x1xf32, #tpu.memory_space<vmem>>, vector<1x32x1xf32>
    tpu.vector_store %arg7[%c0_13, %c0_14, %c0_15], %12 {strides = array<i32>} : memref<1x32x1xf32, #tpu.memory_space<vmem>>, vector<1x32x1xf32>,
    %c0_i32_16 = arith.constant 0 : i32
    %14 = arith.cmpi eq, %arg1, %c0_i32_16 : i32
    %15 = arith.extui %14 : i1 to i32
    %c0_i32_17 = arith.constant 0 : i32
    %16 = arith.cmpi ne, %15, %c0_i32_17 : i32
    scf.if %16 {
      %c0_18 = arith.constant 0 : index
      %c0_19 = arith.constant 0 : index
      %c0_20 = arith.constant 0 : index
      %17 = vector.load %arg6[%c0_18, %c0_19, %c0_20] : memref<1x32x1xf32, #tpu.memory_space<vmem>>, vector<1x32x1xf32>
      %18 = vector.shape_cast %17 : vector<1x32x1xf32> to vector<32x1xf32>
      %cst_21 = arith.constant 3.906250e-03 : f32
      %19 = vector.broadcast %cst_21 : f32 to vector<32x1xf32>
      %20 = arith.mulf %18, %19 : vector<32x1xf32>
      %c0_22 = arith.constant 0 : index
      %c0_23 = arith.constant 0 : index
      %c0_24 = arith.constant 0 : index
      %21 = vector.load %arg7[%c0_22, %c0_23, %c0_24] : memref<1x32x1xf32, #tpu.memory_space<vmem>>, vector<1x32x1xf32>
      %22 = vector.shape_cast %21 : vector<1x32x1xf32> to vector<32x1xf32>
      %23 = tpu.concatenate %20, %22 in 1 : vector<32x1xf32>, vector<32x1xf32> -> vector<32x2xf32>
      %c0_25 = arith.constant 0 : index
      %c0_26 = arith.constant 0 : index
      %24 = vector.load %arg3[%c0_25, %c0_26] : memref<2x32xf32, #tpu.memory_space<vmem>>, vector<2x32xf32>
      %c0_27 = arith.constant 0 : index
      %c0_28 = arith.constant 0 : index
      %25 = vector.load %arg4[%c0_27, %c0_28] : memref<32x2xf32, #tpu.memory_space<vmem>>, vector<32x2xf32>
      %cst_29 = arith.constant dense<0.000000e+00> : vector<2x2xf32>
      %26 = tpu.matmul %24, %23, %cst_29 {dimension_numbers = #tpu.dot_dimension_numbers<[1], [0], [0], [1], [0, 0, 1, 1], [], []>} : vector<2x32xf32>, vector<32x2xf32>, vector<2x2xf32> -> vector<2x2xf32>
      %cst_30 = arith.constant 0.000000e+00 : f32
      %27 = vector.broadcast %cst_30 : f32 to vector<2x2xf32>
      %28 = arith.maximumf %26, %27 : vector<2x2xf32>
      %cst_31 = arith.constant dense<0.000000e+00> : vector<32x2xf32>
      %29 = tpu.matmul %25, %28, %cst_31 {dimension_numbers = #tpu.dot_dimension_numbers<[1], [0], [0], [1], [0, 0, 1, 1], [], []>} : vector<32x2xf32>, vector<2x2xf32>, vector<32x2xf32> -> vector<32x2xf32>
      %30 = vector.extract_strided_slice %29 {offsets = [0, 0], sizes = [32, 1], strides = [1, 1]} : vector<32x2xf32> to vector<32x1xf32>
      %31 = vector.extract_strided_slice %29 {offsets = [0, 1], sizes = [32, 1], strides = [1, 1]} : vector<32x2xf32> to vector<32x1xf32>
      %32 = arith.addf %30, %31 : vector<32x1xf32>
      %33 = arith.negf %32 : vector<32x1xf32>
      %34 = math.exp %33 : vector<32x1xf32>
      %cst_32 = arith.constant 1.000000e+00 : f32
      %35 = vector.broadcast %cst_32 : f32 to vector<32x1xf32>
      %36 = arith.addf %35, %34 : vector<32x1xf32>
      %37 = arith.divf %35, %36 : vector<32x1xf32>
      %38 = vector.shape_cast %37 : vector<32x1xf32> to vector<1x32x1xf32>
      %c0_33 = arith.constant 0 : index
      %c0_34 = arith.constant 0 : index
      %c0_35 = arith.constant 0 : index
      %39 = vector.load %arg5[%c0_33, %c0_34, %c0_35] : memref<1x32x1xf32, #tpu.memory_space<vmem>>, vector<1x32x1xf32>
      tpu.vector_store %arg5[%c0_33, %c0_34, %c0_35], %38 {strides = array<i32>} : memref<1x32x1xf32, #tpu.memory_space<vmem>>, vector<1x32x1xf32>,
    } else {
    }
    return
  }
  func.func @transform_0(%arg0: i32, %arg1: i32) -> (i32, i32, i32) {
    %c0_i32 = arith.constant 0 : i32
    %c0_i32_0 = arith.constant 0 : i32
    return %arg0, %c0_i32, %arg1 : i32, i32, i32
  }
  func.func @transform_1(%arg0: i32, %arg1: i32) -> (i32, i32) {
    %c0_i32 = arith.constant 0 : i32
    %c0_i32_0 = arith.constant 0 : i32
    %c0_i32_1 = arith.constant 0 : i32
    return %c0_i32, %c0_i32_0 : i32, i32
  }
  func.func @transform_2(%arg0: i32, %arg1: i32) -> (i32, i32) {
    %c0_i32 = arith.constant 0 : i32
    %c0_i32_0 = arith.constant 0 : i32
    %c0_i32_1 = arith.constant 0 : i32
    return %c0_i32, %c0_i32_0 : i32, i32
  }
  func.func @transform_3(%arg0: i32, %arg1: i32) -> (i32, i32, i32) {
    %c0_i32 = arith.constant 0 : i32
    %c0_i32_0 = arith.constant 0 : i32
    %c0_i32_1 = arith.constant 0 : i32
    return %arg0, %c0_i32, %c0_i32_0 : i32, i32, i32
  }
}

</mosaic_0001>

<bundles_post_ra>
// kernel: tpu_custom_call.1
= control target key start
LH: loop header
LB: loop body
LE: loop exit
PB: predicated region body
PF: predicated region fallthrough
CT: control target
= control target key end

     0   :  { %8 = vsyncpa [#allocation5], 0  ;;  %s924_s0 = inlined_call_operand.hbm [shape: f32[2,32,256], index: 0, kind: input, shape index: {}]   ;;  %s925_s1 = inlined_call_operand.vmem [shape: f32[2,32], index: 1, kind: input, shape index: {}]   ;;  %s926_s2 = inlined_call_operand.vmem [shape: f32[32,2], index: 2, kind: input, shape index: {}]   ;;  %s927_s3 = inlined_call_operand.vmem [shape: f32[2,32,1], index: 3, kind: output, shape index: {}]  }
   0x1   :  { %10 = vsyncpa [#allocation5 + $0x1], 0  ;;  %s791_s12 = smov 0   ;;  %s793_s13 = smov 0  }
   0x2   :  { %s795_s14 = smov 0   ;;  %s797_s15 = smov 0  }
   0x3   :  { %s799_s16 = smov 0   ;;  %s801_s17 = smov 0  }
   0x4 LB: > { %s569_s18 = sadd.s32 4294967295, %s763_s17   ;;  %s28_s19 = sadd.s32 1, %s759_s16  ;;  %s763_s17 = sphi %s801_s17, %s16_s17   ;;  %s759_s16 = sphi %s799_s16, %s934_s16   ;;  %s755_s15 = sphi %s797_s15, %s933_s15   ;;  %s751_s14 = sphi %s795_s14, %s932_s14   ;;  %s747_s13 = sphi %s793_s13, %s931_s13   ;;  %s743_s12 = sphi %s791_s12, %s930_s12  }
   0x5   : > { %p30_p0 = scmp.ge.s32.totalorder %s28_s19, 2  ;;  %s37_s20 = sadd.s32 1, %s751_s14 }
   0x6   : > { %p44_p1 = scmp.ne.s32.totalorder %s751_s14, %s747_s13  ;;  %p45_p2 = scmp.eq.s32.totalorder %s763_s17, 0 }
   0x7   : > { %s936_s19 = smov (%p30_p0, %s28_s19), 0  ;;  %p50_p4 = scmp.ne.s32.totalorder %s747_s13, %s743_s12 }
   0x8   : > { %p827_p3 = por %p45_p2, %p44_p1  ;;  %s32_s22 = ssub.s32 %s759_s16, %s936_s19 }
   0x9   : > { %p51_p5 = scmp.eq.s32.totalorder %s569_s18, 0  ;;  %p35_p6 = scmp.eq.s32.totalorder %s32_s22, 0 }
   0xa   : > { %p602_p8 = scmp.lt.s32.totalorder %s763_s17, 2  ;;  %s148_s25 = sand.u32 1, %s751_s14  }
   0xb   : > { %p834_p7 = por %p51_p5, %p50_p4  ;;  %s592_s26 = sshll.u32 %s759_s16, 6 }
   0xc   : > { %s840_s24 = scalar_select %p35_p6, %s751_s14, %s37_s20  }
   0xd   : > { %s573_s27 = sshll.u32 %s148_s25, 6  ;;  %s159_s30 = scalar_lea.hbm %s924_s0, %s592_s26 }
   0xe   : > { %s160_s4 = sshll.u32 %s159_s30, 4  ;;  %s152_s5 = scalar_lea.vmem [#allocation4], %s573_s27  ;;  %s161_s4 = int_to_ptr.hbm [resolvable:$true] %s160_s4 }
   0xf   : > { %s162_s6 = sshll.u32 %s152_s5, 4  ;;  %p599_p9 = pnand %p602_p8, %p827_p3  ;;  %s163_s6 = int_to_ptr.vmem [resolvable:$true] %s162_s6 }
  0x10   : > { %p576_p10 = scmp.ge.s32.totalorder %s763_s17, 1  ;;  %p170_p11 = scmp.lt.s32.totalorder %s763_s17, 3 }
  0x11   : > { %s149_s7 = scalar_lea.sflag [#allocation5], %s148_s25  ;;  %s765_s8 = smov 256  }
  0x12   : > { %s766_s9 = smov 16   ;;  %p171_p12 = pnand %p576_p10, %p170_p11 }
  0x13   : > { %601 = dma.hbm_to_vmem [thread:$0]  (!%p599_p9), %s161_s4, 1024, %s163_s6, %s149_s7, %s765_s8, %s765_s8, %s766_s9  }
  0x14   : > { %174 = sbr.rel (%p171_p12) target bundleno = 702 (0x2be), region = 32  ;;  %s176_s10 = sand.u32 (!%p171_p12), 1, %s747_s13  }
  0x15   : > { %s577_s11 = sshll.u32 (!%p171_p12), %s176_s10, 6  ;;  %s177_s12 = scalar_lea.sflag (!%p171_p12), [#allocation5], %s176_s10 }
  0x16   : > { %s180_s18 = scalar_lea.vmem (!%p171_p12), [#allocation4], %s577_s11 }
  0x19   : > { %738 = dma.done.wait (%p834_p7), %s177_s12, 1024  }
  0x1a   : > { %740 = vsyncadd (%p834_p7), %s177_s12, 4294966272  ;;  %vm214_vm0 = vcmask 7168   ;;  %v767_v0 = vmov -inf   ;;  %v225_v1 = vld [vmem:[%s180_s18 + $0x10] sm:$0xff]  ;;  %v226_v2 = vld [vmem:[%s180_s18 + $0x18] sm:$0xff]  ;;  %v768_v17 = vmov 0.0  }
  0x1b   : > { %220 = vst.msk [vmem:[#allocation3 + $0x8] sm:$0xff] %vm214_vm0, %v767_v0  ;;  %v263_v3 = vmax.f32 %v225_v1, %v226_v2  ;;  %v229_v4 = vld [vmem:[%s180_s18 + $0x30] sm:$0xff]  ;;  %v230_v5 = vld [vmem:[%s180_s18 + $0x38] sm:$0xff]  ;;  %v223_v8 = vld [vmem:[%s180_s18] sm:$0xff]  ;;  %v238_v15 = vadd.f32 %v226_v2, %v225_v1  ;;  %s769_s20 = smov 1   ;;  %vm320_vm1 = vcmask 261120  }
  0x1c   : > { %219 = vst.msk [vmem:[#allocation3] sm:$0xff] %vm214_vm0, %v767_v0  ;;  %v269_v6 = vmax.f32 %v229_v4, %v230_v5  ;;  %v244_v7 = vadd.f32 %v230_v5, %v229_v4  ;;  %v224_v9 = vld [vmem:[%s180_s18 + $0x8] sm:$0xff]  ;;  %v227_v10 = vld [vmem:[%s180_s18 + $0x20] sm:$0xff]  ;;  %vm358_vm2 = vcmask 1041408   ;;  %vm345_vm3 = vcmask 15360   ;;  %s770_s5 = smov 127  }
  0x1d   : > { %221 = vst.msk [vmem:[#allocation3 + $0x10] sm:$0xff] %vm214_vm0, %v767_v0  ;;  %264 = vmax.xlane.f32.xlu1 %v263_v3  ;;  %v228_v11 = vld [vmem:[%s180_s18 + $0x28] sm:$0xff]  ;;  %v260_v12 = vmax.f32 %v223_v8, %v224_v9  ;;  %v235_v16 = vadd.f32 %v224_v9, %v223_v8  ;;  %v315_v1 = vld [vmem:[%s925_s1] sm:$0x3]  ;;  %v318_v8 = vld [vmem:[%s926_s2 + $0x10] sm:$0xff]  ;;  %p205_p13 = scmp.lt.s32.totalorder %s755_s15, 1 }
  0x1e   : > { %222 = vst.msk [vmem:[#allocation3 + $0x18] sm:$0xff] %vm214_vm0, %v767_v0  ;;  %270 = vmax.xlane.f32.xlu0 %v269_v6  ;;  %245 = vadd.xlane.f32.xlu2 %v244_v7  ;;  %v266_v13 = vmax.f32 %v227_v10, %v228_v11  ;;  %v241_v14 = vadd.f32 %v228_v11, %v227_v10  ;;  %v316_v5 = vld [vmem:[%s926_s2] sm:$0xff]  ;;  %v317_v6 = vld [vmem:[%s926_s2 + $0x8] sm:$0xff]  ;;  %v319_v7 = vld [vmem:[%s926_s2 + $0x18] sm:$0xff] }
  0x1f   : > { %218 = vst.msk [vmem:[#allocation2 + $0x18] sm:$0xff] %vm214_vm0, %v768_v17  ;;  %s938_s15 = smov (!%p205_p13, %s755_s15), 1 }
  0x20   : > { %215 = vst.msk [vmem:[#allocation2] sm:$0xff] %vm214_vm0, %v768_v17  ;;  %s593_s6 = sshll.u32 %s938_s15, 5 }
  0x21   : > { %216 = vst.msk [vmem:[#allocation2 + $0x8] sm:$0xff] %vm214_vm0, %v768_v17  ;;  %s896_s9 = scalar_lea.vmem %s927_s3, %s593_s6 }
  0x22   : > { %217 = vst.msk [vmem:[#allocation2 + $0x10] sm:$0xff] %vm214_vm0, %v768_v17  ;;  %v257_v18 = vld [vmem:[#allocation3 + $0x8] sm:$0xff] }
  0x23   : > { %v256_v27 = vld [vmem:[#allocation3] sm:$0xff] }
  0x24   : > { %v258_v28 = vld [vmem:[#allocation3 + $0x10] sm:$0xff] }
  0x25   : > { %261 = vmax.xlane.f32.xlu1 %v260_v12  ;;  %v259_v19 = vld [vmem:[#allocation3 + $0x18] sm:$0xff] }
  0x26   : > { %267 = vmax.xlane.f32.xlu0 %v266_v13  ;;  %242 = vadd.xlane.f32.xlu2 %v241_v14  ;;  %v234_v20 = vld [vmem:[#allocation2 + $0x18] sm:$0xff] }
  0x27   : > { %v231_v45 = vld [vmem:[#allocation2] sm:$0xff] }
  0x28   : > { %v232_v42 = vld [vmem:[#allocation2 + $0x8] sm:$0xff] }
  0x29   : > { %v233_v29 = vld [vmem:[#allocation2 + $0x10] sm:$0xff] }
  0x2d   : > { %236 = vadd.xlane.f32.xlu1 %v235_v16 }
  0x2e   : > { %239 = vadd.xlane.f32.xlu0 %v238_v15 }
  0x90   : > { %v265_v21 = vpop.xlane.xlu1 %264 }
  0x91   : > { %v273_v22 = vmax.f32 %v257_v18, %v265_v21  ;;  %v271_v23 = vpop.xlane.xlu0 %270  ;;  %v246_v24 = vpop.xlane.xlu2 %245 }
  0x92   : > { %v275_v25 = vmax.f32 %v259_v19, %v271_v23  ;;  %v250_v26 = vadd.f32 %v246_v24, %v234_v20 }
  0x93   : > { %277 = vst.msk [vmem:[#allocation3 + $0x8] sm:$0xff] %vm214_vm0, %v273_v22 }
  0x94   : > { %279 = vst.msk [vmem:[#allocation3 + $0x18] sm:$0xff] %vm214_vm0, %v275_v25 }
  0x95   : > { %255 = vst.msk [vmem:[#allocation2 + $0x18] sm:$0xff] %vm214_vm0, %v250_v26 }
  0x98   : > { %v262_v30 = vpop.xlane.xlu1 %261 }
  0x99   : > { %v272_v31 = vmax.f32 %v256_v27, %v262_v30  ;;  %v268_v32 = vpop.xlane.xlu0 %267  ;;  %v243_v33 = vpop.xlane.xlu2 %242 }
  0x9a   : > { %v274_v34 = vmax.f32 %v258_v28, %v268_v32  ;;  %v249_v35 = vadd.f32 %v243_v33, %v233_v29  ;;  %v292_v38 = vld [vmem:[#allocation3 + $0x8] sm:$0xff] }
  0x9b   : > { %276 = vst.msk [vmem:[#allocation3] sm:$0xff] %vm214_vm0, %v272_v31  ;;  %v294_v36 = vld [vmem:[#allocation3 + $0x18] sm:$0xff] }
  0x9c   : > { %278 = vst.msk [vmem:[#allocation3 + $0x10] sm:$0xff] %vm214_vm0, %v274_v34  ;;  %v286_v48 = vld [vmem:[#allocation2 + $0x18] sm:$0xff] }
  0x9d   : > { %254 = vst.msk [vmem:[#allocation2 + $0x10] sm:$0xff] %vm214_vm0, %v249_v35  ;;  %v290_v50 = vmul.f32 0.00390625, %v286_v48 }
  0xa0   : > { %v237_v46 = vpop.xlane.xlu1 %236 }
  0xa1   : > { %v240_v43 = vpop.xlane.xlu0 %239  ;;  %v247_v47 = vadd.f32 %v237_v46, %v231_v45 }
  0xa2   : > { %v291_v37 = vld [vmem:[#allocation3] sm:$0xff]  ;;  %v248_v44 = vadd.f32 %v240_v43, %v232_v42 }
  0xa3   : > { %v662_v39 = vpack.i.bf16 %v291_v37, %v292_v38  ;;  %v293_v40 = vld [vmem:[#allocation3 + $0x10] sm:$0xff]  ;;  %252 = vst.msk [vmem:[#allocation2] sm:$0xff] %vm214_vm0, %v247_v47 }
  0xa4   : > { %v657_v41 = vpack.i.bf16 %v293_v40, %v294_v36  ;;  %253 = vst.msk [vmem:[#allocation2 + $0x8] sm:$0xff] %vm214_vm0, %v248_v44  ;;  %v285_v49 = vld [vmem:[#allocation2 + $0x10] sm:$0xff] }
  0xa5   : > { %663 = vrot.lane.b32.xlu0 %v662_v39, %s769_s20  ;;  %v289_v51 = vmul.f32 0.00390625, %v285_v49 }
  0xa6   : > { %658 = vrot.lane.b32.xlu2 %v657_v41, %s769_s20 }
  0xaa   : > { %v283_v58 = vld [vmem:[#allocation2] sm:$0xff] }
  0xab   : > { %v284_v57 = vld [vmem:[#allocation2 + $0x8] sm:$0xff]  ;;  %v287_v63 = vmul.f32 0.00390625, %v283_v58 }
  0xac   : > { %v288_v62 = vmul.f32 0.00390625, %v284_v57 }
 0x100   : > { %v659_v52 = vpop.permute.xlu2 %658 }
 0x101   : > { %v661_v53 = vunpack.i.h.bf16 %v659_v52  ;;  %v660_v54 = vunpack.i.l.bf16 %v659_v52 }
 0x103   : > { %v314_v55 = vsel %vm214_vm0, %v290_v50, %v660_v54  ;;  %v313_v56 = vsel %vm214_vm0, %v289_v51, %v661_v53 }
 0x104   : > { %336 = vmatpush.msra.mxu0 %v314_v55 }
 0x106   : > { %337 = vmatpush.msra.mxu0 %v313_v56 }
 0x117   : > { %v664_v59 = vpop.permute.xlu0 %663 }
 0x118   : > { %v666_v60 = vunpack.i.h.bf16 %v664_v59  ;;  %v665_v61 = vunpack.i.l.bf16 %v664_v59 }
 0x11a   : > { %v312_v0 = vsel %vm214_vm0, %v288_v62, %v665_v61  ;;  %v311_v2 = vsel %vm214_vm0, %v287_v63, %v666_v60 }
 0x11b   : > { %338 = vmatpush.msra.mxu0 %v312_v0 }
 0x11d   : > { %339 = vmatpush.msra.mxu0 %v311_v2 }
 0x11e   : > { %580 = vmatmul.msk.f32.vlgmr.msra.gmra.mxu0 %vm320_vm1, %v315_v1 }
 0x19b   : > { %v341_v3 = vpop.f32.mrf.mxu0 }
 0x19c   : > { %v344_v4 = vmax.f32 %v341_v3, 0.0 }
 0x19e   : > { %581 = vmatpush.msk.msra.mxu1 %vm358_vm2, %v344_v4  ;;  %594 = vmatpush.msk.msra.mxu2 %vm358_vm2, %v344_v4 }
 0x19f   : > { %595 = vmatpush.msk.msra.mxu3 %vm358_vm2, %v344_v4  ;;  %582 = vmatmul.msk.f32.vlgmr.msra.gmra.mxu1 %vm345_vm3, %v316_v5 }
 0x1a0   : > { %583 = vmatmul.msk.f32.vlgmr.msra.gmra.mxu2 %vm345_vm3, %v317_v6  ;;  %585 = vmatmul.msk.f32.vlgmr.msra.gmra.mxu3 %vm345_vm3, %v319_v7 }
 0x1a8   : > { %584 = vmatmul.msk.f32.gmra.mxu2 %vm345_vm3, %v318_v8 }
 0x21c   : > { %v379_v9 = vpop.f32.mrf.mxu1 }
 0x21d   : > { %395 = vrot.lane.b32.xlu1 %v379_v9, %s770_s5 }
 0x223   : > { %v382_v10 = vpop.f32.mrf.mxu2  ;;  %v388_v11 = vpop.f32.mrf.mxu3 }
 0x224   : > { %397 = vrot.lane.b32.xlu2 %v382_v10, %s770_s5 }
 0x22b   : > { %v385_v12 = vpop.f32.mrf.mxu2 }
 0x22c   : > { %401 = vrot.lane.b32.xlu2 %v388_v11, %s770_s5  ;;  %399 = vrot.lane.b32.xlu0 %v385_v12, %s770_s5 }
 0x27e   : > { %v398_v13 = vpop.permute.xlu2 %397 }
 0x27f   : > { %v408_v14 = vadd.f32 %v398_v13, %v382_v10 }
 0x281   : > { %v587_v15 = vmul.f32 -1.442695, %v408_v14 }
 0x283   : > { %667 = vpow2.f32 %v587_v15 }
 0x286   : > { %v402_v16 = vpop.permute.xlu2 %401 }
 0x287   : > { %v410_v17 = vadd.f32 %v402_v16, %v388_v11 }
 0x289   : > { %v668_v18 = vpop.eup %667  ;;  %v589_v19 = vmul.f32 -1.442695, %v410_v17 }
 0x28a   : > { %v424_v20 = vadd.f32 1.0, %v668_v18 }
 0x28b   : > { %669 = vpow2.f32 %v589_v19 }
 0x28c   : > { %671 = vrcp.f32 %v424_v20  ;;  %v453_v29 = vand.u32 2147483648, %v424_v20  ;;  %v451_v31 = vand.u32 2147483647, %v424_v20  ;;  %vm447_vm5 = vweird.f32 %v424_v20 }
 0x28e   : > { %v454_v34 = vor.u32 1.1754944e-38, %v453_v29  ;;  %vm452_vm7 = vcmp.eq.f32.partialorder %v451_v31, 8.507059e+37 }
 0x28f   : > { %v396_v21 = vpop.permute.xlu1 %395 }
 0x290   : > { %v407_v22 = vadd.f32 %v396_v21, %v379_v9 }
 0x291   : > { %v670_v23 = vpop.eup %669 }
 0x292   : > { %v672_v24 = vpop.eup %671  ;;  %v426_v25 = vadd.f32 1.0, %v670_v23  ;;  %v586_v26 = vmul.f32 -1.442695, %v407_v22 }
 0x293   : > { %v443_v27 = vmul.f32 %v672_v24, %v424_v20  ;;  %vm448_vm4 = vweird.f32 %v672_v24 }
 0x294   : > { %673 = vrcp.f32 %v426_v25  ;;  %vm449_vm6 = vmor %vm447_vm5, %vm448_vm4  ;;  %v483_v41 = vand.u32 2147483648, %v426_v25  ;;  %v481_v44 = vand.u32 2147483647, %v426_v25  ;;  %vm477_vm9 = vweird.f32 %v426_v25 }
 0x295   : > { %v444_v28 = vsub.f32 1.0, %v443_v27  ;;  %675 = vpow2.f32 %v586_v26 }
 0x296   : > { %v484_v48 = vor.u32 1.1754944e-38, %v483_v41  ;;  %vm482_vm11 = vcmp.eq.f32.partialorder %v481_v44, 8.507059e+37 }
 0x297   : > { %v445_v30 = vmul.f32 %v672_v24, %v444_v28 }
 0x299   : > { %v446_v32 = vadd.f32 %v672_v24, %v445_v30 }
 0x29a   : > { %v674_v33 = vpop.eup %673 }
 0x29b   : > { %v676_v35 = vpop.eup %675  ;;  %v450_v36 = vsel %vm449_vm6, %v672_v24, %v446_v32  ;;  %v473_v37 = vmul.f32 %v674_v33, %v426_v25  ;;  %vm478_vm8 = vweird.f32 %v674_v33 }
 0x29c   : > { %v455_v38 = vsel %vm452_vm7, %v454_v34, %v450_v36  ;;  %v423_v39 = vadd.f32 1.0, %v676_v35  ;;  %vm479_vm10 = vmor %vm477_vm9, %vm478_vm8 }
 0x29d   : > { %488 = vst.msk [vmem:[%s896_s9 + $0x8] sm:$0xff] %vm214_vm0, %v455_v38  ;;  %v474_v40 = vsub.f32 1.0, %v473_v37 }
 0x29e   : > { %677 = vrcp.f32 %v423_v39  ;;  %v400_v42 = vpop.permute.xlu0 %399  ;;  %v438_v54 = vand.u32 2147483648, %v423_v39  ;;  %v436_v57 = vand.u32 2147483647, %v423_v39  ;;  %vm432_vm13 = vweird.f32 %v423_v39 }
 0x29f   : > { %v475_v43 = vmul.f32 %v674_v33, %v474_v40  ;;  %v409_v45 = vadd.f32 %v400_v42, %v385_v12 }
 0x2a0   : > { %v439_v60 = vor.u32 1.1754944e-38, %v438_v54  ;;  %vm437_vm15 = vcmp.eq.f32.partialorder %v436_v57, 8.507059e+37 }
 0x2a1   : > { %v476_v46 = vadd.f32 %v674_v33, %v475_v43  ;;  %v588_v47 = vmul.f32 -1.442695, %v409_v45 }
 0x2a3   : > { %v480_v49 = vsel %vm479_vm10, %v674_v33, %v476_v46  ;;  %679 = vpow2.f32 %v588_v47 }
 0x2a4   : > { %v678_v50 = vpop.eup %677  ;;  %v485_v51 = vsel %vm482_vm11, %v484_v48, %v480_v49 }
 0x2a5   : > { %490 = vst.msk [vmem:[%s896_s9 + $0x18] sm:$0xff] %vm214_vm0, %v485_v51  ;;  %v428_v52 = vmul.f32 %v678_v50, %v423_v39  ;;  %vm433_vm12 = vweird.f32 %v678_v50 }
 0x2a6   : > { %vm434_vm14 = vmor %vm432_vm13, %vm433_vm12 }
 0x2a7   : > { %v429_v53 = vsub.f32 1.0, %v428_v52 }
 0x2a9   : > { %v680_v55 = vpop.eup %679  ;;  %v430_v56 = vmul.f32 %v678_v50, %v429_v53 }
 0x2aa   : > { %v425_v58 = vadd.f32 1.0, %v680_v55 }
 0x2ab   : > { %v431_v59 = vadd.f32 %v678_v50, %v430_v56 }
 0x2ac   : > { %681 = vrcp.f32 %v425_v58  ;;  %v468_v2 = vand.u32 2147483648, %v425_v58  ;;  %v466_v4 = vand.u32 2147483647, %v425_v58  ;;  %vm462_vm2 = vweird.f32 %v425_v58 }
 0x2ad   : > { %v435_v61 = vsel %vm434_vm14, %v678_v50, %v431_v59 }
 0x2ae   : > { %v440_v62 = vsel %vm437_vm15, %v439_v60, %v435_v61  ;;  %v469_v6 = vor.u32 1.1754944e-38, %v468_v2  ;;  %vm467_vm4 = vcmp.eq.f32.partialorder %v466_v4, 8.507059e+37 }
 0x2af   : > { %487 = vst.msk [vmem:[%s896_s9] sm:$0xff] %vm214_vm0, %v440_v62 }
 0x2b2   : > { %v682_v63 = vpop.eup %681 }
 0x2b3   : > { %v458_v0 = vmul.f32 %v682_v63, %v425_v58  ;;  %vm463_vm1 = vweird.f32 %v682_v63 }
 0x2b4   : > { %vm464_vm3 = vmor %vm462_vm2, %vm463_vm1 }
 0x2b5   : > { %v459_v1 = vsub.f32 1.0, %v458_v0 }
 0x2b7   : > { %v460_v3 = vmul.f32 %v682_v63, %v459_v1 }
 0x2b9   : > { %v461_v5 = vadd.f32 %v682_v63, %v460_v3 }
 0x2bb   : > { %v465_v7 = vsel %vm464_vm3, %v682_v63, %v461_v5 }
 0x2bc   : > { %v470_v8 = vsel %vm467_vm4, %v469_v6, %v465_v7 }
 0x2bd   : > { %489 = vst.msk [vmem:[%s896_s9 + $0x10] sm:$0xff] %vm214_vm0, %v470_v8 }
 0x2be PF: > { %s16_s17 = sadd.s32 1, %s763_s17   ;;  %s930_s12 = smov %s747_s13 }
 0x2bf   : > { %p13_p0 = scmp.ge.s32.totalorder %s16_s17, 4   ;;  %s931_s13 = smov %s751_s14 }
 0x2c0   : > { %s932_s14 = smov %s840_s24  ;;  %s933_s15 = smov %s759_s16 }
 0x2c1   : > { %s934_s16 = smov %s936_s19  ;;  %15 = sbr.rel (!%p13_p0) target bundleno = 4 (0x4), region = 80 }
 0x2c6   :  { %512 = vsyncpa [#allocation5], 1 }
 0x2c7   :  { %514 = vsyncpa [#allocation5 + $0x1], 1 }

</bundles_post_ra>
